<compile_context>
chip_gen: v7x
topology: tpu7x:2x2x1
jax: 0.10.0
libtpu: 0.0.40
codegen_flags: <defaults>
</compile_context>

<pallas_src>
import functools

import jax
import jax.numpy as jnp
from jax import lax
from jax.experimental import pallas as pl
from jax.experimental.pallas import tpu as pltpu


def _gelu_mul(a, b, out_dtype):
    # Exact GELU in f32 on the first half, multiply by the gate half.
    # The gate stays in its native dtype (bf16 gate -> promote in the mul),
    # trimming vreg pressure for low-precision inputs.
    af = a.astype(jnp.float32)
    inv_sqrt2 = jnp.float32(0.7071067811865476)
    g = 0.5 * af * (1.0 + lax.erf(af * inv_sqrt2))
    return (g * b).astype(out_dtype)


def _geglu_split_kernel(a_ref, b_ref, o_ref):
    # Two-operand fast path: halves arrive as separate VMEM tiles.
    o_ref[...] = _gelu_mul(a_ref[...], b_ref[...], o_ref.dtype)


def _geglu_fused_kernel(x_ref, o_ref):
    # Fallback path for h % 128 != 0: split inside the kernel.
    h = x_ref.shape[-1] // 2
    o_ref[...] = _gelu_mul(x_ref[:, :h], x_ref[:, h:], o_ref.dtype)


def _pick_tiles(m, h, c, itemsize, split):
    """Choose (tm, tn) so one grid step uses ~6 MiB VMEM (pre double-buffer)."""
    step_budget = 6 * 1024 * 1024

    if split:
        tn = h
        # Split very wide feature axes so even an 8-row block fits the budget.
        while tn % 256 == 0 and tn > 512 and 3 * tn * itemsize * 8 > step_budget:
            tn //= 2
        row_bytes = 3 * tn * itemsize          # a tile + b tile + out tile
    else:
        tn = h                                  # full half-width output block
        row_bytes = (c + h) * itemsize          # full-width in + half-width out

    tm = step_budget // max(row_bytes, 1)
    tm = max(8, min(1024, (tm // 8) * 8))

    m_pad8 = ((m + 7) // 8) * 8
    tm = min(tm, m_pad8)

    # Guarantee >= 2 row-grid steps when possible (v7x has 2 TensorCores and
    # only shards "parallel" axes with multiple steps).
    if m_pad8 >= 16 and -(-m_pad8 // tm) < 2:
        tm = max(8, ((m_pad8 // 2) // 8) * 8)

    # Prefer a tm that divides M exactly (avoids a padding copy) when a large
    # enough divisor exists; otherwise the wrapper pads rows with zeros.
    if m % tm != 0 and m % 8 == 0:
        t = (min(tm, m) // 8) * 8
        lo = max(8, tm // 2)
        while t >= lo:
            if m % t == 0:
                tm = t
                break
            t -= 8

    return tm, tn


@functools.partial(jax.jit, static_argnames=("block_rows", "block_cols"))
def geglu(x, *, block_rows=None, block_cols=None):
    """GeGELU: gelu(x[..., :c//2]) * x[..., c//2:]."""
    orig_shape = x.shape
    c = orig_shape[-1]
    assert c % 2 == 0, "last dim must be even for GeGELU"
    h = c // 2

    m = 1
    for d in orig_shape[:-1]:
        m *= d
    x2 = x.reshape(m, c)
    itemsize = jnp.dtype(x.dtype).itemsize

    split = (h % 128 == 0)

    tm, tn = _pick_tiles(m, h, c, itemsize, split)
    if block_rows is not None:
        tm = block_rows
    if block_cols is not None:
        tn = block_cols
    assert h % tn == 0

    # Pad rows with zeros if tm does not divide M (gelu(0) * 0 == 0, safe).
    m_pad = -(-m // tm) * tm
    if m_pad != m:
        x2 = jnp.pad(x2, ((0, m_pad - m), (0, 0)))

    cost = pl.CostEstimate(
        flops=6 * m_pad * h,
        transcendentals=m_pad * h,
        bytes_accessed=itemsize * (m_pad * c + m_pad * h),
    )

    if split:
        ncb = h // tn  # number of column blocks per half
        grid = (m_pad // tm, ncb)
        out2 = pl.pallas_call(
            _geglu_split_kernel,
            out_shape=jax.ShapeDtypeStruct((m_pad, h), x.dtype),
            grid_spec=pltpu.PrefetchScalarGridSpec(
                num_scalar_prefetch=0,
                grid=grid,
                in_specs=[
                    pl.BlockSpec((tm, tn), lambda i, j: (i, j)),
                    pl.BlockSpec((tm, tn), lambda i, j, _o=ncb: (i, j + _o)),
                ],
                out_specs=pl.BlockSpec((tm, tn), lambda i, j: (i, j)),
            ),
            compiler_params=pltpu.CompilerParams(
                dimension_semantics=("parallel", "parallel"),
                vmem_limit_bytes=48 * 1024 * 1024,
            ),
            cost_estimate=cost,
        )(x2, x2)
    else:
        grid = (m_pad // tm,)
        out2 = pl.pallas_call(
            _geglu_fused_kernel,
            out_shape=jax.ShapeDtypeStruct((m_pad, h), x.dtype),
            grid_spec=pltpu.PrefetchScalarGridSpec(
                num_scalar_prefetch=0,
                grid=grid,
                in_specs=[pl.BlockSpec((tm, c), lambda i: (i, 0))],
                out_specs=pl.BlockSpec((tm, h), lambda i: (i, 0)),
            ),
            compiler_params=pltpu.CompilerParams(
                dimension_semantics=("parallel",),
                vmem_limit_bytes=48 * 1024 * 1024,
            ),
            cost_estimate=cost,
        )(x2)

    if m_pad != m:
        out2 = out2[:m]
    return out2.reshape(*orig_shape[:-1], h)


def _geglu_ref(x):
    c = x.shape[-1]
    h = c // 2
    return jax.nn.gelu(x[..., :h], approximate=False) * x[..., h:]


if __name__ == "__main__":
    key = jax.random.PRNGKey(0)

    # 1) Small shape consistent with the module (batch=2, seq=8, hidden=32);
    #    h=16 is not 128-aligned -> exercises the fused fallback path.
    x_small = jax.random.normal(key, (2, 8, 32), dtype=jnp.float32)
    out_small = jax.block_until_ready(geglu(x_small))
    ref_small = _geglu_ref(x_small)
    assert out_small.shape == (2, 8, 16), out_small.shape
    assert jnp.allclose(out_small, ref_small, atol=1e-5, rtol=1e-5), float(
        jnp.max(jnp.abs(out_small - ref_small))
    )

    # 2) Small 128-aligned shape -> exercises the two-operand split fast path.
    key2 = jax.random.PRNGKey(0)
    x_aligned = jax.random.normal(key2, (2, 8, 256), dtype=jnp.float32)
    out_aligned = jax.block_until_ready(geglu(x_aligned))
    ref_aligned = _geglu_ref(x_aligned)
    assert out_aligned.shape == (2, 8, 128), out_aligned.shape
    assert jnp.allclose(out_aligned, ref_aligned, atol=1e-5, rtol=1e-5), float(
        jnp.max(jnp.abs(out_aligned - ref_aligned))
    )

    print("KERNEL_OK")
</pallas_src>

<mosaic_0001>
module attributes {stable_mosaic.version = 11 : i64} {
  func.func @_geglu_fused_kernel(%arg0: i32, %arg1: memref<8x32xf32, #tpu.memory_space<vmem>>, %arg2: memref<8x16xf32, #tpu.memory_space<vmem>>) attributes {dimension_semantics = [#tpu.dimension_semantics<parallel>], iteration_bounds = array<i64: 2>, scalar_prefetch = 0 : i64, scratch_operands = 0 : i64, tpu.core_type = #tpu.core_type<tc>, window_params = [{transform_indices = @transform_0, window_bounds = array<i64: 8, 32>}, {transform_indices = @transform_1, window_bounds = array<i64: 8, 16>}]} {
    %c0 = arith.constant 0 : index
    %c0_0 = arith.constant 0 : index
    %0 = vector.load %arg1[%c0, %c0_0] : memref<8x32xf32, #tpu.memory_space<vmem>>, vector<8x16xf32>
    %c0_1 = arith.constant 0 : index
    %c16 = arith.constant 16 : index
    %1 = vector.load %arg1[%c0_1, %c16] : memref<8x32xf32, #tpu.memory_space<vmem>>, vector<8x16xf32>
    %cst = arith.constant 5.000000e-01 : f32
    %2 = vector.broadcast %cst : f32 to vector<8x16xf32>
    %3 = arith.mulf %2, %0 : vector<8x16xf32>
    %cst_2 = arith.constant 0.707106769 : f32
    %4 = vector.broadcast %cst_2 : f32 to vector<8x16xf32>
    %5 = arith.mulf %0, %4 : vector<8x16xf32>
    %6 = math.erf %5 : vector<8x16xf32>
    %cst_3 = arith.constant 1.000000e+00 : f32
    %7 = vector.broadcast %cst_3 : f32 to vector<8x16xf32>
    %8 = arith.addf %7, %6 : vector<8x16xf32>
    %9 = arith.mulf %3, %8 : vector<8x16xf32>
    %10 = arith.mulf %9, %1 : vector<8x16xf32>
    %c0_4 = arith.constant 0 : index
    %c0_5 = arith.constant 0 : index
    %11 = vector.load %arg2[%c0_4, %c0_5] : memref<8x16xf32, #tpu.memory_space<vmem>>, vector<8x16xf32>
    tpu.vector_store %arg2[%c0_4, %c0_5], %10 {strides = array<i32>} : memref<8x16xf32, #tpu.memory_space<vmem>>, vector<8x16xf32>,
    return
  }
  func.func @transform_0(%arg0: i32) -> (i32, i32) {
    %c0_i32 = arith.constant 0 : i32
    %c0_i32_0 = arith.constant 0 : i32
    return %arg0, %c0_i32 : i32, i32
  }
  func.func @transform_1(%arg0: i32) -> (i32, i32) {
    %c0_i32 = arith.constant 0 : i32
    %c0_i32_0 = arith.constant 0 : i32
    return %arg0, %c0_i32 : i32, i32
  }
}

</mosaic_0001>

<bundles_post_ra>
// kernel: geglu.1
= control target key start
LH: loop header
LB: loop body
LE: loop exit
PB: predicated region body
PF: predicated region fallthrough
CT: control target
= control target key end

     0   :  { %6 = vsyncpa [#allocation3], 0  ;;  %s562_s0 = inlined_call_operand.hbm [shape: f32[16,32], index: 0, kind: input, shape index: {}]   ;;  %s563_s1 = inlined_call_operand.hbm [shape: f32[16,16], index: 1, kind: output, shape index: {}]  }
   0x1   :  { %8 = vsyncpa [#allocation3 + $0x1], 0 }
   0x2   :  { %9 = vsyncpa [#allocation4], 0 }
   0x3   :  { %11 = vsyncpa [#allocation4 + $0x1], 0  ;;  %s401_s6 = smov 0   ;;  %s403_s7 = smov 0  }
   0x4   :  { %s405_s8 = smov 0   ;;  %s407_s9 = smov 0  }
   0x5 LB: > { %s422_s10 = sadd.s32 4294967295, %s386_s9   ;;  %s229_s11 = sadd.s32 4294967294, %s386_s9   ;;  %s386_s9 = sphi %s407_s9, %s578_s9   ;;  %s382_s8 = sphi %s405_s8, %s577_s8   ;;  %s378_s7 = sphi %s403_s7, %s576_s7   ;;  %s374_s6 = sphi %s401_s6, %s575_s6  }
   0x6   : > { %s426_s12 = sadd.s32 1, %s386_s9   ;;  %s24_s13 = sadd.s32 1, %s382_s8 }
   0x7   : > { %s21_s14 = ssub.s32 %s386_s9, %s426_s12  ;;  %p31_p0 = scmp.ne.s32.totalorder %s382_s8, %s378_s7 }
   0x8   : > { %p22_p1 = scmp.eq.s32.totalorder %s21_s14, 0  ;;  %p32_p2 = scmp.eq.s32.totalorder %s386_s9, 0 }
   0x9   : > { %p37_p3 = scmp.ne.s32.totalorder %s378_s7, %s374_s6  ;;  %p38_p4 = scmp.eq.s32.totalorder %s422_s10, 0 }
   0xa   : > { %s438_s15 = scalar_select %p22_p1, %s382_s8, %s24_s13  }
   0xb   : > { %p440_p5 = por %p32_p2, %p31_p0  ;;  %p444_p6 = por %p38_p4, %p37_p3 }
   0xc   : > { %p61_p7 = scmp.eq.s32.totalorder %s422_s10, 1  ;;  %p67_p8 = scmp.eq.s32.totalorder %s229_s11, 1 }
   0xd   : > { %p253_p10 = scmp.lt.s32.totalorder %s386_s9, 2  ;;  %s87_s20 = sand.u32 1, %s382_s8  }
   0xe   : > { %p451_p11 = por %p61_p7, %p31_p0  ;;  %p455_p12 = por %p67_p8, %p37_p3 }
   0xf   : > { %s233_s21 = sshll.u32 %s386_s9, 7  ;;  %s232_s22 = sshll.u32 %s87_s20, 3 }
  0x10   : > { %s567_s18 = scalar_select %p451_p11, 1, 0 }
  0x11   : > { %s568_s19 = scalar_select %p455_p12, 1, 0 }
  0x12   : > { %s464_s25 = scalar_lea.hbm %s562_s0, %s233_s21  ;;  %s91_s26 = scalar_lea.vmem [#allocation2], %s232_s22 }
  0x13   : > { %s98_s27 = sshll.u32 %s91_s26, 4  ;;  %p468_p13 = pnand %p253_p10, %p440_p5  ;;  %s472_s27 = int_to_ptr.vmem [resolvable:$true] %s98_s27 }
  0x14   : > { %s88_s29 = scalar_lea.sflag [#allocation3], %s87_s20  ;;  %s290_s30 = scalar_lea.hbm %s464_s25, 128 }
  0x15   : > { %p291_p2 = scmp.ne.s32.totalorder %s464_s25, %s290_s30  ;;  %p292_p3 = pneg %p468_p13 }
  0x16   : > { %s295_s4 = scalar_lea.hbm %s562_s0, 256  ;;  %p296_p5 = scmp.lt.u32.totalorder %s464_s25, %s562_s0 }
  0x17   : > { %p293_p4 = pnand %p292_p3, %p291_p2  ;;  %p297_p8 = scmp.lt.u32.totalorder %s295_s4, %s290_s30 }
  0x18   : > { %p299_p9 = scmp.lt.u32.totalorder %s290_s30, %s464_s25 }
  0x19   : > { %p294_p7 = pneg %p293_p4  ;;  %p298_p10 = por %p297_p8, %p296_p5 }
  0x1b   : > { %p300_p0 = por %p299_p9, %p298_p10 }
  0x1d   : > { %p301_p1 = pnand %p300_p0, %p294_p7 }
  0x1f   : > { %304 = shalt.err (!%p301_p1)
}
  0x20   : > { %s305_s13 = scalar_lea.vmem %s472_s27, 128  ;;  %s388_s14 = smov [#allocation2]  }
  0x21   : > { %p306_p2 = scmp.ne.s32.totalorder %s472_s27, %s305_s13  ;;  %s310_s16 = sshll.u32 %s388_s14, 4  ;;  %s311_s16 = int_to_ptr.vmem [resolvable:$false] %s310_s16 }
  0x22   : > { %s312_s20 = scalar_lea.vmem %s311_s16, 256  ;;  %p313_p11 = scmp.lt.s32.totalorder %s472_s27, %s311_s16 }
  0x23   : > { %p308_p4 = pnand %p306_p2, %p292_p3  ;;  %p314_p5 = scmp.lt.s32.totalorder %s312_s20, %s305_s13 }
  0x25   : > { %p309_p12 = pneg %p308_p4  ;;  %p315_p8 = por %p314_p5, %p313_p11 }
  0x27   : > { %p316_p9 = pnand %p315_p8, %p309_p12 }
  0x29   : > { %319 = shalt.err (!%p316_p9)
}
  0x2a   : > { %248 = dma.hbm_to_vmem [thread:$0]  (!%p468_p13), %s464_s25, 128, %s472_s27, %s88_s29  }
  0x2b   : > { %p570_p0 = scmp.lt.s32.totalorder %s386_s9, 3  ;;  %p571_p1 = scmp.ge.s32.totalorder %s386_s9, 1 }
  0x2d   : > { %p104_p3 = pnand %p571_p1, %p570_p0 }
  0x2e   : > { %s506_s21 = sand.u32 (!%p104_p3), 1, %s378_s7  }
  0x2f   : > { %107 = sbr.rel (%p104_p3) target bundleno = 187 (0xbb), region = 24  ;;  %s235_s22 = sshll.u32 (!%p104_p3), %s506_s21, 3 }
  0x30   : > { %s110_s23 = scalar_lea.sflag (!%p104_p3), [#allocation3], %s506_s21  ;;  %s113_s24 = scalar_lea.vmem (!%p104_p3), [#allocation2], %s235_s22 }
  0x36   : > { %365 = dma.done.wait (%p444_p6), %s110_s23, 128  }
  0x37   : > { %367 = vsyncadd (%p444_p6), %s110_s23, 4294967168  ;;  %v132_v0 = vld [vmem:[%s113_s24] sm:$0xff]  ;;  %s389_s25 = smov 112   ;;  %s238_s26 = sshll.u32 %s422_s10, 7  ;;  %vm143_vm0 = vcmask 130048  }
  0x38   : > { %139 = vrot.lane.b32.xlu0 %v132_v0, %s389_s25  ;;  %v134_v1 = vmul.f32 0.70710677, %v132_v0  ;;  %v133_v3 = vmul.f32 0.5, %v132_v0  ;;  %s131_s27 = scalar_lea.vmem [#allocation5], %s235_s22  ;;  %s518_s30 = scalar_lea.hbm %s563_s1, %s238_s26 }
  0x39   : > { %s159_s28 = sshll.u32 %s131_s27, 4  ;;  %s146_s2 = scalar_lea.sflag [#allocation4], %s506_s21  ;;  %s520_s28 = int_to_ptr.vmem [resolvable:$true] %s159_s28 }
  0x3a   : > { %288 = verf.f32 %v134_v1  ;;  %s320_s3 = scalar_lea.vmem %s520_s28, 128  ;;  %p572_p11 = scmp.ne.s32.totalorder %s567_s18, 0 }
  0x3b   : > { %p321_p6 = scmp.ne.s32.totalorder %s520_s28, %s320_s3  ;;  %s390_s10 = smov [#allocation5]  }
  0x3c   : > { %s324_s4 = sshll.u32 %s390_s10, 4  ;;  %s325_s4 = int_to_ptr.vmem [resolvable:$false] %s324_s4 }
  0x3d   : > { %p322_p12 = pnand %p321_p6, %p572_p11  ;;  %s326_s5 = scalar_lea.vmem %s325_s4, 256 }
  0x3e   : > { %p327_p7 = scmp.lt.s32.totalorder %s520_s28, %s325_s4  ;;  %p328_p10 = scmp.lt.s32.totalorder %s326_s5, %s320_s3 }
  0x3f   : > { %p323_p13 = pneg %p322_p12 }
  0x40   : > { %p329_p2 = por %p328_p10, %p327_p7 }
  0x42   : > { %p330_p4 = pnand %p329_p2, %p323_p13 }
  0x44   : > { %v289_v2 = vpop.eup %288 }
  0x45   : > { %v136_v4 = vadd.f32 1.0, %v289_v2 }
  0x47   : > { %v137_v5 = vmul.f32 %v136_v4, %v133_v3 }
  0xaa   : > { %v140_v6 = vpop.permute.xlu0 %139 }
  0xab   : > { %v142_v7 = vmul.f32 %v140_v6, %v137_v5 }
  0xad   : > { %144 = vst.msk [vmem:[%s131_s27] sm:$0xff] %vm143_vm0, %v142_v7 }
  0xae   : > { %333 = shalt.err (!%p330_p4)
}
  0xaf   : > { %s334_s11 = scalar_lea.hbm %s518_s30, 128  ;;  %s338_s16 = scalar_lea.hbm %s563_s1, 256 }
  0xb0   : > { %p335_p5 = scmp.ne.s32.totalorder %s518_s30, %s334_s11  ;;  %p339_p0 = scmp.lt.u32.totalorder %s518_s30, %s563_s1 }
  0xb1   : > { %p340_p1 = scmp.lt.u32.totalorder %s338_s16, %s334_s11  ;;  %p342_p6 = scmp.lt.u32.totalorder %s334_s11, %s518_s30 }
  0xb2   : > { %p336_p8 = pnand %p335_p5, %p572_p11 }
  0xb3   : > { %p341_p3 = por %p340_p1, %p339_p0 }
  0xb4   : > { %p337_p9 = pneg %p336_p8 }
  0xb5   : > { %p343_p12 = por %p342_p6, %p341_p3 }
  0xb7   : > { %p344_p13 = pnand %p343_p12, %p337_p9 }
  0xb9   : > { %347 = shalt.err (!%p344_p13)
}
  0xba   : > { %243 = dma.vmem_to_hbm [thread:$0]  (%p572_p11), %s520_s28, 128, %s518_s30, %s146_s2  }
  0xbb PF: > { %s171_s22 = sand.u32 1, %s374_s6   ;;  %p573_p7 = scmp.ne.s32.totalorder %s568_s19, 0 }
  0xbc   : > { %p574_p10 = scmp.ge.s32.totalorder %s386_s9, 2  ;;  %s172_s23 = scalar_lea.sflag [#allocation4], %s171_s22 }
  0xbe   : > { %p250_p2 = pnand %p574_p10, %p573_p7 }
  0xc0   : > { %369 = dma.done.wait (!%p250_p2), %s172_s23, 128  }
  0xc1   : > { %371 = vsyncadd (!%p250_p2), %s172_s23, 4294967168  ;;  %p14_p4 = scmp.ge.s32.totalorder %s426_s12, 4   ;;  %s575_s6 = smov %s378_s7 }
  0xc2   : > { %s576_s7 = smov %s382_s8  ;;  %s577_s8 = smov %s438_s15 }
  0xc3   : > { %s578_s9 = smov %s426_s12  ;;  %16 = sbr.rel (!%p14_p4) target bundleno = 5 (0x5), region = 69 }
  0xca   :  { %177 = vsyncpa [#allocation3], 1 }
  0xcb   :  { %179 = vsyncpa [#allocation3 + $0x1], 1 }
  0xcc   :  { %180 = vsyncpa [#allocation4], 1 }
  0xcd   :  { %182 = vsyncpa [#allocation4 + $0x1], 1 }

</bundles_post_ra>
